<compile_context>
chip_gen: v5e
topology: v5e:2x2
jax: 0.10.0
libtpu: 0.0.40
codegen_flags: <defaults>
</compile_context>

<pallas_src>
import jax
import jax.numpy as jnp
from jax.experimental import pallas as pl
from jax.experimental.pallas import tpu as pltpu


def _round_up(v, m):
    return (v + m - 1) // m * m


def fcn_kernel(x_ref, w1_ref, b1_ref, w2_ref, b2_ref, o_ref):
    # fc1: Linear (bf16 MXU, f32 accumulate) + bias + ReLU (f32 VPU)
    h = jnp.dot(x_ref[...], w1_ref[...], preferred_element_type=jnp.float32)
    h = jnp.maximum(h + b1_ref[...], 0.0)
    # fc2: Linear (cast activation to bf16 for the MXU) + bias + Sigmoid
    z = jnp.dot(h.astype(w2_ref.dtype), w2_ref[...],
                preferred_element_type=jnp.float32)
    z = z + b2_ref[...]
    # sigmoid: exp on EUP, approx reciprocal also on EUP -> VALU stays free
    o_ref[...] = pl.reciprocal(1.0 + jnp.exp(-z), approx=True).astype(o_ref.dtype)


def fcn_forward(x, w1, b1, w2, b2, *, block_b=512):
    """x: (B, C, H, W) or already-flat (B, D). Flatten/pad is wrapper glue."""
    B = x.shape[0]
    x2d = x.reshape(B, -1).astype(jnp.float32)
    D = x2d.shape[1]
    Hid = w1.shape[1]
    O = w2.shape[1]

    LANE = 128   # lane width
    SUB = 16     # bf16 sublane packing
    Dp = _round_up(D, LANE)
    Hp = _round_up(Hid, LANE)
    Op = _round_up(O, LANE)
    # Batch tile: multiple of 16 (bf16 sublanes); cap keeps the double-buffered
    # x tile small enough for v7x's 64 MiB VMEM and v5e's 16 MiB scoped default.
    TB = min(block_b, _round_up(B, SUB))
    Bp = _round_up(B, TB)

    # Zero-padding keeps the math identical: padded hidden cols stay 0 through
    # ReLU, padded w2 rows contribute 0, padded output cols are sliced off.
    xp = jnp.zeros((Bp, Dp), jnp.bfloat16).at[:B, :D].set(x2d.astype(jnp.bfloat16))
    w1p = jnp.zeros((Dp, Hp), jnp.bfloat16).at[:D, :Hid].set(w1.astype(jnp.bfloat16))
    b1p = jnp.zeros((1, Hp), jnp.float32).at[:, :Hid].set(b1.astype(jnp.float32))
    w2p = jnp.zeros((Hp, Op), jnp.bfloat16).at[:Hid, :O].set(w2.astype(jnp.bfloat16))
    b2p = jnp.zeros((1, Op), jnp.float32).at[:, :O].set(b2.astype(jnp.float32))

    out_padded = pl.pallas_call(
        fcn_kernel,
        out_shape=jax.ShapeDtypeStruct((Bp, Op), jnp.float32),
        grid_spec=pltpu.PrefetchScalarGridSpec(
            num_scalar_prefetch=0,
            grid=(pl.cdiv(Bp, TB),),
            in_specs=[
                pl.BlockSpec((TB, Dp), lambda i: (i, 0)),   # x: tiled over batch
                pl.BlockSpec((Dp, Hp), lambda i: (0, 0)),   # w1: resident
                pl.BlockSpec((1, Hp), lambda i: (0, 0)),    # b1: resident
                pl.BlockSpec((Hp, Op), lambda i: (0, 0)),   # w2: resident
                pl.BlockSpec((1, Op), lambda i: (0, 0)),    # b2: resident
            ],
            out_specs=pl.BlockSpec((TB, Op), lambda i: (i, 0)),
        ),
        compiler_params=pltpu.CompilerParams(
            dimension_semantics=("parallel",),   # batch axis -> both TCs on v7x
        ),
    )(xp, w1p, b1p, w2p, b2p)
    return out_padded[:B, :O]


def init_params(key, input_size, hidden_size, output_size):
    """Deterministic init matching nn.Linear's U(-1/sqrt(fan_in), 1/sqrt(fan_in))."""
    k1, k2, k3, k4 = jax.random.split(key, 4)
    lim1 = 1.0 / jnp.sqrt(input_size)
    lim2 = 1.0 / jnp.sqrt(hidden_size)
    w1 = jax.random.uniform(k1, (input_size, hidden_size), jnp.float32, -lim1, lim1)
    b1 = jax.random.uniform(k2, (1, hidden_size), jnp.float32, -lim1, lim1)
    w2 = jax.random.uniform(k3, (hidden_size, output_size), jnp.float32, -lim2, lim2)
    b2 = jax.random.uniform(k4, (1, output_size), jnp.float32, -lim2, lim2)
    return w1, b1, w2, b2


if __name__ == "__main__":
    key = jax.random.PRNGKey(0)
    kx, kp = jax.random.split(key)

    # Small shapes consistent with the module: x is flattened inside forward,
    # so input_size = C*H*W.
    B, C, Hh, Ww = 2, 4, 16, 16
    input_size = C * Hh * Ww   # 1024
    hidden_size = 32
    output_size = 8

    x = jax.random.normal(kx, (B, C, Hh, Ww), jnp.float32)
    w1, b1, w2, b2 = init_params(kp, input_size, hidden_size, output_size)

    out = fcn_forward(x, w1, b1, w2, b2)
    out = jax.block_until_ready(out)

    # Reference check in plain JAX f32 (bf16 matmuls -> relaxed tolerance).
    x2d = x.reshape(B, -1)
    ref = jax.nn.sigmoid(jnp.maximum(x2d @ w1 + b1, 0.0) @ w2 + b2)
    assert out.shape == (B, output_size)
    assert jnp.allclose(out, ref, atol=2e-2), "mismatch vs reference"

    print("KERNEL_OK")
</pallas_src>

<mosaic_0001>
module attributes {stable_mosaic.version = 11 : i64} {
  func.func @fcn_kernel(%arg0: i32, %arg1: memref<16x1024xbf16, #tpu.memory_space<vmem>>, %arg2: memref<1024x128xbf16, #tpu.memory_space<vmem>>, %arg3: memref<1x128xf32, #tpu.memory_space<vmem>>, %arg4: memref<128x128xbf16, #tpu.memory_space<vmem>>, %arg5: memref<1x128xf32, #tpu.memory_space<vmem>>, %arg6: memref<16x128xf32, #tpu.memory_space<vmem>>) attributes {dimension_semantics = [#tpu.dimension_semantics<parallel>], iteration_bounds = array<i64: 1>, scalar_prefetch = 0 : i64, scratch_operands = 0 : i64, tpu.core_type = #tpu.core_type<tc>, window_params = [{transform_indices = @transform_0, window_bounds = array<i64: 16, 1024>}, {pipeline_mode = #tpu.pipeline_mode<synchronous>, transform_indices = @transform_1, window_bounds = array<i64: 1024, 128>}, {pipeline_mode = #tpu.pipeline_mode<synchronous>, transform_indices = @transform_2, window_bounds = array<i64: 1, 128>}, {pipeline_mode = #tpu.pipeline_mode<synchronous>, transform_indices = @transform_3, window_bounds = array<i64: 128, 128>}, {pipeline_mode = #tpu.pipeline_mode<synchronous>, transform_indices = @transform_4, window_bounds = array<i64: 1, 128>}, {transform_indices = @transform_5, window_bounds = array<i64: 16, 128>}]} {
    %c0 = arith.constant 0 : index
    %c0_0 = arith.constant 0 : index
    %0 = vector.load %arg1[%c0, %c0_0] : memref<16x1024xbf16, #tpu.memory_space<vmem>>, vector<16x1024xbf16>
    %c0_1 = arith.constant 0 : index
    %c0_2 = arith.constant 0 : index
    %1 = vector.load %arg2[%c0_1, %c0_2] : memref<1024x128xbf16, #tpu.memory_space<vmem>>, vector<1024x128xbf16>
    %cst = arith.constant dense<0.000000e+00> : vector<16x128xf32>
    %2 = tpu.matmul %0, %1, %cst {dimension_numbers = #tpu.dot_dimension_numbers<[1], [0], [0], [1], [0, 0, 1, 1], [], []>} : vector<16x1024xbf16>, vector<1024x128xbf16>, vector<16x128xf32> -> vector<16x128xf32>
    %c0_3 = arith.constant 0 : index
    %c0_4 = arith.constant 0 : index
    %3 = vector.load %arg3[%c0_3, %c0_4] : memref<1x128xf32, #tpu.memory_space<vmem>>, vector<1x128xf32>
    %4 = vector.broadcast %3 : vector<1x128xf32> to vector<16x128xf32>
    %5 = arith.addf %2, %4 : vector<16x128xf32>
    %cst_5 = arith.constant 0.000000e+00 : f32
    %6 = vector.broadcast %cst_5 : f32 to vector<16x128xf32>
    %7 = arith.maximumf %5, %6 : vector<16x128xf32>
    %8 = arith.truncf %7 : vector<16x128xf32> to vector<16x128xbf16>
    %c0_6 = arith.constant 0 : index
    %c0_7 = arith.constant 0 : index
    %9 = vector.load %arg4[%c0_6, %c0_7] : memref<128x128xbf16, #tpu.memory_space<vmem>>, vector<128x128xbf16>
    %cst_8 = arith.constant dense<0.000000e+00> : vector<16x128xf32>
    %10 = tpu.matmul %8, %9, %cst_8 {dimension_numbers = #tpu.dot_dimension_numbers<[1], [0], [0], [1], [0, 0, 1, 1], [], []>} : vector<16x128xbf16>, vector<128x128xbf16>, vector<16x128xf32> -> vector<16x128xf32>
    %c0_9 = arith.constant 0 : index
    %c0_10 = arith.constant 0 : index
    %11 = vector.load %arg5[%c0_9, %c0_10] : memref<1x128xf32, #tpu.memory_space<vmem>>, vector<1x128xf32>
    %12 = vector.broadcast %11 : vector<1x128xf32> to vector<16x128xf32>
    %13 = arith.addf %10, %12 : vector<16x128xf32>
    %cst_11 = arith.constant 0.000000e+00 : f32
    %14 = vector.broadcast %cst_11 : f32 to vector<16x128xf32>
    %15 = arith.subf %14, %13 : vector<16x128xf32>
    %16 = math.exp %15 : vector<16x128xf32>
    %cst_12 = arith.constant 1.000000e+00 : f32
    %17 = vector.broadcast %cst_12 : f32 to vector<16x128xf32>
    %18 = arith.addf %17, %16 : vector<16x128xf32>
    %19 = tpu.reciprocal %18 {approx = true} : vector<16x128xf32> -> vector<16x128xf32>
    %c0_13 = arith.constant 0 : index
    %c0_14 = arith.constant 0 : index
    %20 = vector.load %arg6[%c0_13, %c0_14] : memref<16x128xf32, #tpu.memory_space<vmem>>, vector<16x128xf32>
    tpu.vector_store %arg6[%c0_13, %c0_14], %19 {strides = array<i32>} : memref<16x128xf32, #tpu.memory_space<vmem>>, vector<16x128xf32>,
    return
  }
  func.func @transform_0(%arg0: i32) -> (i32, i32) {
    %c0_i32 = arith.constant 0 : i32
    %c0_i32_0 = arith.constant 0 : i32
    return %arg0, %c0_i32 : i32, i32
  }
  func.func @transform_1(%arg0: i32) -> (i32, i32) {
    %c0_i32 = arith.constant 0 : i32
    %c0_i32_0 = arith.constant 0 : i32
    %c0_i32_1 = arith.constant 0 : i32
    return %c0_i32, %c0_i32_0 : i32, i32
  }
  func.func @transform_2(%arg0: i32) -> (i32, i32) {
    %c0_i32 = arith.constant 0 : i32
    %c0_i32_0 = arith.constant 0 : i32
    %c0_i32_1 = arith.constant 0 : i32
    return %c0_i32, %c0_i32_0 : i32, i32
  }
  func.func @transform_3(%arg0: i32) -> (i32, i32) {
    %c0_i32 = arith.constant 0 : i32
    %c0_i32_0 = arith.constant 0 : i32
    %c0_i32_1 = arith.constant 0 : i32
    return %c0_i32, %c0_i32_0 : i32, i32
  }
  func.func @transform_4(%arg0: i32) -> (i32, i32) {
    %c0_i32 = arith.constant 0 : i32
    %c0_i32_0 = arith.constant 0 : i32
    %c0_i32_1 = arith.constant 0 : i32
    return %c0_i32, %c0_i32_0 : i32, i32
  }
  func.func @transform_5(%arg0: i32) -> (i32, i32) {
    %c0_i32 = arith.constant 0 : i32
    %c0_i32_0 = arith.constant 0 : i32
    return %arg0, %c0_i32 : i32, i32
  }
}

</mosaic_0001>

<bundles_post_ra>
// kernel: tpu_custom_call.1
= control target key start
LH: loop header
LB: loop body
LE: loop exit
PB: predicated region body
PF: predicated region fallthrough
CT: control target
= control target key end

     0   :  { %10 = vsyncpa [#allocation3], 0  ;;  %s1441_s0 = inlined_call_operand.hbm [shape: bf16[16,1024], index: 0, kind: input, shape index: {}]   ;;  %s1442_s1 = inlined_call_operand.hbm [shape: bf16[1024,128], index: 1, kind: input, shape index: {}]   ;;  %s1443_s2 = inlined_call_operand.vmem [shape: f32[1,128], index: 2, kind: input, shape index: {}]   ;;  %s1444_s3 = inlined_call_operand.hbm [shape: bf16[128,128], index: 3, kind: input, shape index: {}]   ;;  %s1445_s4 = inlined_call_operand.vmem [shape: f32[1,128], index: 4, kind: input, shape index: {}]   ;;  %s1446_s5 = inlined_call_operand.hbm [shape: f32[16,128], index: 5, kind: output, shape index: {}]  }
   0x1   :  { %11 = vsyncpa [#allocation6], 0  ;;  %s30_s20 = sshll.u32 %s1442_s1, 4  ;;  %s31_s20 = int_to_ptr.hbm [resolvable:$true] %s30_s20 }
   0x2   :  { %12 = vsyncpa [#allocation4], 0  ;;  %s1383_s21 = smov [#allocation5]   ;;  %s17_s25 = sshll.u32 %s1441_s0, 4  ;;  %s18_s25 = int_to_ptr.hbm [resolvable:$true] %s17_s25 }
   0x3   :  { %s32_s22 = sshll.u32 %s1383_s21, 4  ;;  %s1384_s26 = smov 64   ;;  %s33_s22 = int_to_ptr.vmem [resolvable:$true] %s32_s22 }
   0x4   :  { %s1385_s27 = smov 4   ;;  %s1386_s28 = smov [#allocation2]  }
   0x5   :  { %38 = dma.hbm_to_vmem [thread:$0]  %s31_s20, 8192, %s33_s22, [#allocation6], %s1384_s26, %s1384_s26, %s1385_s27  }
   0x6   :  { %s19_s29 = sshll.u32 %s1386_s28, 4  ;;  %s1387_s30 = smov 512   ;;  %s20_s29 = int_to_ptr.vmem [resolvable:$true] %s19_s29 }
   0x7   :  { %s1388_s6 = smov 32   ;;  %s45_s8 = sshll.u32 %s1444_s3, 4  ;;  %s46_s8 = int_to_ptr.hbm [resolvable:$true] %s45_s8 }
   0x8   :  { %25 = dma.hbm_to_vmem [thread:$0]  %s18_s25, 1024, %s20_s29, [#allocation3], %s1387_s30, %s1387_s30, %s1388_s6  }
   0x9   :  { %s1389_s9 = smov [#allocation7]  }
   0xa   :  { %s47_s10 = sshll.u32 %s1389_s9, 4  ;;  %s48_s10 = int_to_ptr.vmem [resolvable:$true] %s47_s10 }
   0xb   :  { %53 = dma.hbm_to_vmem [thread:$0]  %s46_s8, 1024, %s48_s10, [#allocation6], %s1384_s26, %s1384_s26, %s1385_s27  }
   0xc   :  { %1377 = dma.done.wait [#allocation3], 1024  }
   0xd   :  { %1378 = vsyncadd [#allocation3], 4294966272 }
   0xe   :  { %1379 = dma.done.wait [#allocation6], 9216  }
   0xf   :  { %1380 = vsyncadd [#allocation6], 4294958080  ;;  %v1196_v0 = vld [vmem:[#allocation5 + $0x38] sm:$0xff]  ;;  %v1195_v4 = vld [vmem:[#allocation5 + $0x30] sm:$0xff]  ;;  %s1390_s12 = smov [#allocation8]   ;;  %s847_s15 = sshll.u32 %s1446_s5, 4  ;;  %s848_s15 = int_to_ptr.hbm [resolvable:$true] %s847_s15 }
  0x10   :  { %v1204_v1 = vld [vmem:[#allocation5 + $0x78] sm:$0xff]  ;;  %632 = vmatpush.bf16.msra.mxu0 %v1196_v0  ;;  %v1203_v5 = vld [vmem:[#allocation5 + $0x70] sm:$0xff]  ;;  %v1194_v8 = vld [vmem:[#allocation5 + $0x28] sm:$0xff]  ;;  %s1391_s16 = smov 128   ;;  %s1392_s17 = smov 8  }
  0x11   :  { %v1212_v2 = vld [vmem:[#allocation5 + $0xb8] sm:$0xff]  ;;  %646 = vmatpush.bf16.msra.mxu1 %v1204_v1  ;;  %v1211_v6 = vld [vmem:[#allocation5 + $0xb0] sm:$0xff]  ;;  %v1202_v9 = vld [vmem:[#allocation5 + $0x68] sm:$0xff] }
  0x12   :  { %v1220_v3 = vld [vmem:[#allocation5 + $0xf8] sm:$0xff]  ;;  %660 = vmatpush.bf16.msra.mxu2 %v1212_v2  ;;  %v1219_v7 = vld [vmem:[#allocation5 + $0xf0] sm:$0xff]  ;;  %v1210_v10 = vld [vmem:[#allocation5 + $0xa8] sm:$0xff] }
  0x13   :  { %674 = vmatpush.bf16.msra.mxu3 %v1220_v3  ;;  %v1218_v11 = vld [vmem:[#allocation5 + $0xe8] sm:$0xff]  ;;  %v1193_v12 = vld [vmem:[#allocation5 + $0x20] sm:$0xff]  ;;  %v1192_v16 = vld [vmem:[#allocation5 + $0x18] sm:$0xff] }
  0x14   :  { %633 = vmatpush.bf16.msra.mxu0 %v1195_v4  ;;  %v1201_v13 = vld [vmem:[#allocation5 + $0x60] sm:$0xff]  ;;  %v1200_v17 = vld [vmem:[#allocation5 + $0x58] sm:$0xff]  ;;  %v1191_v20 = vld [vmem:[#allocation5 + $0x10] sm:$0xff] }
  0x15   :  { %647 = vmatpush.bf16.msra.mxu1 %v1203_v5  ;;  %v1209_v14 = vld [vmem:[#allocation5 + $0xa0] sm:$0xff]  ;;  %v1208_v18 = vld [vmem:[#allocation5 + $0x98] sm:$0xff]  ;;  %v1199_v21 = vld [vmem:[#allocation5 + $0x50] sm:$0xff] }
  0x16   :  { %661 = vmatpush.bf16.msra.mxu2 %v1211_v6  ;;  %v1217_v15 = vld [vmem:[#allocation5 + $0xe0] sm:$0xff]  ;;  %v1216_v19 = vld [vmem:[#allocation5 + $0xd8] sm:$0xff]  ;;  %v1207_v22 = vld [vmem:[#allocation5 + $0x90] sm:$0xff] }
  0x17   :  { %675 = vmatpush.bf16.msra.mxu3 %v1219_v7  ;;  %v1215_v23 = vld [vmem:[#allocation5 + $0xd0] sm:$0xff]  ;;  %v1190_v24 = vld [vmem:[#allocation5 + $0x8] sm:$0xff]  ;;  %v1189_v28 = vld [vmem:[#allocation5] sm:$0xff] }
  0x18   :  { %634 = vmatpush.bf16.msra.mxu0 %v1194_v8  ;;  %v1198_v25 = vld [vmem:[#allocation5 + $0x48] sm:$0xff]  ;;  %v1197_v29 = vld [vmem:[#allocation5 + $0x40] sm:$0xff]  ;;  %v1228_v32 = vld [vmem:[#allocation5 + $0x138] sm:$0xff] }
  0x19   :  { %648 = vmatpush.bf16.msra.mxu1 %v1202_v9  ;;  %v1206_v26 = vld [vmem:[#allocation5 + $0x88] sm:$0xff]  ;;  %v1205_v30 = vld [vmem:[#allocation5 + $0x80] sm:$0xff]  ;;  %v1236_v33 = vld [vmem:[#allocation5 + $0x178] sm:$0xff] }
  0x1a   :  { %662 = vmatpush.bf16.msra.mxu2 %v1210_v10  ;;  %v1214_v27 = vld [vmem:[#allocation5 + $0xc8] sm:$0xff]  ;;  %v1213_v31 = vld [vmem:[#allocation5 + $0xc0] sm:$0xff]  ;;  %v1244_v42 = vld [vmem:[#allocation5 + $0x1b8] sm:$0xff] }
  0x1b   :  { %676 = vmatpush.bf16.msra.mxu3 %v1218_v11  ;;  %v871_v34 = vld [vmem:[#allocation2 + $0x8] sm:$0xf]  ;;  %v863_v36 = vld [vmem:[#allocation2] sm:$0xf]  ;;  %v1182_v38 = vld [vmem:[#allocation2 + $0xc] sm:$0xf] }
  0x1c   :  { %635 = vmatpush.bf16.msra.mxu0 %v1193_v12  ;;  %v1186_v35 = vld [vmem:[#allocation2 + $0x24] sm:$0xf0]  ;;  %v1185_v37 = vld [vmem:[#allocation2 + $0x1c] sm:$0xf0]  ;;  %v873_v39 = vld [vmem:[#allocation2 + $0x28] sm:$0xf0] }
  0x1d   :  { %649 = vmatpush.bf16.msra.mxu1 %v1201_v13  ;;  %v1181_v40 = vld [vmem:[#allocation2 + $0x4] sm:$0xf]  ;;  %v1252_v43 = vld [vmem:[#allocation5 + $0x1f8] sm:$0xff]  ;;  %v872_v44 = vor.u32 %v1186_v35, %v871_v34  ;;  %v864_v45 = vor.u32 %v1185_v37, %v863_v36  ;;  %v876_v46 = vor.u32 %v1182_v38, %v873_v39  ;;  %v1227_v48 = vld [vmem:[#allocation5 + $0x130] sm:$0xff] }
  0x1e   :  { %663 = vmatpush.bf16.msra.mxu2 %v1209_v14  ;;  %v865_v41 = vld [vmem:[#allocation2 + $0x20] sm:$0xf0]  ;;  %v1235_v49 = vld [vmem:[#allocation5 + $0x170] sm:$0xff]  ;;  %v1226_v52 = vld [vmem:[#allocation5 + $0x128] sm:$0xff] }
  0x1f   :  { %677 = vmatpush.bf16.msra.mxu3 %v1217_v15  ;;  %v868_v47 = vor.u32 %v1181_v40, %v865_v41  ;;  %v1243_v50 = vld [vmem:[#allocation5 + $0x1b0] sm:$0xff]  ;;  %v1234_v53 = vld [vmem:[#allocation5 + $0x168] sm:$0xff]  ;;  %v1225_v56 = vld [vmem:[#allocation5 + $0x120] sm:$0xff] }
  0x20   :  { %636 = vmatpush.bf16.msra.mxu0 %v1192_v16  ;;  %v1251_v51 = vld [vmem:[#allocation5 + $0x1f0] sm:$0xff]  ;;  %v1242_v54 = vld [vmem:[#allocation5 + $0x1a8] sm:$0xff]  ;;  %v1233_v57 = vld [vmem:[#allocation5 + $0x160] sm:$0xff] }
  0x21   :  { %650 = vmatpush.bf16.msra.mxu1 %v1200_v17  ;;  %v1250_v55 = vld [vmem:[#allocation5 + $0x1e8] sm:$0xff]  ;;  %v1241_v58 = vld [vmem:[#allocation5 + $0x1a0] sm:$0xff]  ;;  %v1224_v60 = vld [vmem:[#allocation5 + $0x118] sm:$0xff] }
  0x22   :  { %664 = vmatpush.bf16.msra.mxu2 %v1208_v18  ;;  %v1249_v59 = vld [vmem:[#allocation5 + $0x1e0] sm:$0xff]  ;;  %v1232_v61 = vld [vmem:[#allocation5 + $0x158] sm:$0xff]  ;;  %v1223_v0 = vld [vmem:[#allocation5 + $0x110] sm:$0xff] }
  0x23   :  { %678 = vmatpush.bf16.msra.mxu3 %v1216_v19  ;;  %v1240_v62 = vld [vmem:[#allocation5 + $0x198] sm:$0xff]  ;;  %v1231_v1 = vld [vmem:[#allocation5 + $0x150] sm:$0xff]  ;;  %v1222_v4 = vld [vmem:[#allocation5 + $0x108] sm:$0xff] }
  0x24   :  { %637 = vmatpush.bf16.msra.mxu0 %v1191_v20  ;;  %v1248_v63 = vld [vmem:[#allocation5 + $0x1d8] sm:$0xff]  ;;  %v1239_v2 = vld [vmem:[#allocation5 + $0x190] sm:$0xff]  ;;  %v1230_v5 = vld [vmem:[#allocation5 + $0x148] sm:$0xff] }
  0x25   :  { %651 = vmatpush.bf16.msra.mxu1 %v1199_v21  ;;  %v1247_v3 = vld [vmem:[#allocation5 + $0x1d0] sm:$0xff]  ;;  %v1238_v6 = vld [vmem:[#allocation5 + $0x188] sm:$0xff]  ;;  %v1221_v8 = vld [vmem:[#allocation5 + $0x100] sm:$0xff] }
  0x26   :  { %665 = vmatpush.bf16.msra.mxu2 %v1207_v22  ;;  %v1246_v7 = vld [vmem:[#allocation5 + $0x1c8] sm:$0xff]  ;;  %v1229_v9 = vld [vmem:[#allocation5 + $0x140] sm:$0xff]  ;;  %v879_v12 = vld [vmem:[#allocation2 + $0x10] sm:$0xf] }
  0x27   :  { %679 = vmatpush.bf16.msra.mxu3 %v1215_v23  ;;  %v1237_v10 = vld [vmem:[#allocation5 + $0x180] sm:$0xff]  ;;  %v1187_v13 = vld [vmem:[#allocation2 + $0x2c] sm:$0xf0]  ;;  %v1183_v14 = vld [vmem:[#allocation2 + $0x14] sm:$0xf] }
  0x28   :  { %638 = vmatpush.bf16.msra.mxu0 %v1190_v24  ;;  %v1245_v11 = vld [vmem:[#allocation5 + $0x1c0] sm:$0xff]  ;;  %v881_v15 = vld [vmem:[#allocation2 + $0x30] sm:$0xf0]  ;;  %v887_v16 = vld [vmem:[#allocation2 + $0x18] sm:$0xf]  ;;  %v880_v20 = vor.u32 %v1187_v13, %v879_v12 }
  0x29   :  { %652 = vmatpush.bf16.msra.mxu1 %v1198_v25  ;;  %v1188_v17 = vld [vmem:[#allocation2 + $0x34] sm:$0xf0]  ;;  %v1184_v18 = vld [vmem:[#allocation2 + $0x1c] sm:$0xf]  ;;  %v884_v21 = vor.u32 %v1183_v14, %v881_v15  ;;  %v1259_v25 = vld [vmem:[#allocation7 + $0x30] sm:$0xff] }
  0x2a   :  { %666 = vmatpush.bf16.msra.mxu2 %v1206_v26  ;;  %v889_v19 = vld [vmem:[#allocation2 + $0x38] sm:$0xf0]  ;;  %v888_v22 = vor.u32 %v1188_v17, %v887_v16  ;;  %v1258_v26 = vld [vmem:[#allocation7 + $0x28] sm:$0xff]  ;;  %v1271_v34 = vld [vmem:[%s1443_s2] ss:$0 sm:$0xff] }
  0x2b   :  { %680 = vmatpush.bf16.msra.mxu3 %v1214_v27  ;;  %v892_v23 = vor.u32 %v1184_v18, %v889_v19  ;;  %v1260_v24 = vld [vmem:[#allocation7 + $0x38] sm:$0xff]  ;;  %v1257_v27 = vld [vmem:[#allocation7 + $0x20] sm:$0xff] }
  0x2c   :  { %639 = vmatpush.bf16.msra.mxu0 %v1189_v28  ;;  %v1256_v28 = vld [vmem:[#allocation7 + $0x18] sm:$0xff] }
  0x2d   :  { %653 = vmatpush.bf16.msra.mxu1 %v1197_v29  ;;  %v1255_v29 = vld [vmem:[#allocation7 + $0x10] sm:$0xff] }
  0x2e   :  { %667 = vmatpush.bf16.msra.mxu2 %v1205_v30 }
  0x2f   :  { %681 = vmatpush.bf16.msra.mxu3 %v1213_v31  ;;  %640 = vmatmul.bf16.vlgmr.msra.gmra.mxu0 %v864_v45  ;;  %v1254_v31 = vld [vmem:[#allocation7 + $0x8] sm:$0xff] }
  0x30   :  { %688 = vmatpush.bf16.msrb.mxu0 %v1228_v32  ;;  %654 = vmatmul.bf16.vlgmr.msra.gmra.mxu1 %v868_v47 }
  0x31   :  { %702 = vmatpush.bf16.msrb.mxu1 %v1236_v33  ;;  %668 = vmatmul.bf16.vlgmr.msra.gmra.mxu2 %v872_v44  ;;  %v1253_v33 = vld [vmem:[#allocation7] sm:$0xff] }
  0x32   :  { %716 = vmatpush.bf16.msrb.mxu2 %v1244_v42  ;;  %682 = vmatmul.bf16.vlgmr.msra.gmra.mxu3 %v876_v46 }
  0x33   :  { %730 = vmatpush.bf16.msrb.mxu3 %v1252_v43 }
  0x34   :  { %689 = vmatpush.bf16.msrb.mxu0 %v1227_v48 }
  0x35   :  { %703 = vmatpush.bf16.msrb.mxu1 %v1235_v49 }
  0x36   :  { %717 = vmatpush.bf16.msrb.mxu2 %v1243_v50 }
  0x37   :  { %731 = vmatpush.bf16.msrb.mxu3 %v1251_v51 }
  0x38   :  { %690 = vmatpush.bf16.msrb.mxu0 %v1226_v52 }
  0x39   :  { %704 = vmatpush.bf16.msrb.mxu1 %v1234_v53 }
  0x3a   :  { %718 = vmatpush.bf16.msrb.mxu2 %v1242_v54 }
  0x3b   :  { %732 = vmatpush.bf16.msrb.mxu3 %v1250_v55 }
  0x3c   :  { %691 = vmatpush.bf16.msrb.mxu0 %v1225_v56 }
  0x3d   :  { %705 = vmatpush.bf16.msrb.mxu1 %v1233_v57 }
  0x3e   :  { %719 = vmatpush.bf16.msrb.mxu2 %v1241_v58 }
  0x3f   :  { %733 = vmatpush.bf16.msrb.mxu3 %v1249_v59 }
  0x40   :  { %692 = vmatpush.bf16.msrb.mxu0 %v1224_v60 }
  0x41   :  { %706 = vmatpush.bf16.msrb.mxu1 %v1232_v61 }
  0x42   :  { %720 = vmatpush.bf16.msrb.mxu2 %v1240_v62 }
  0x43   :  { %734 = vmatpush.bf16.msrb.mxu3 %v1248_v63 }
  0x44   :  { %693 = vmatpush.bf16.msrb.mxu0 %v1223_v0 }
  0x45   :  { %707 = vmatpush.bf16.msrb.mxu1 %v1231_v1 }
  0x46   :  { %721 = vmatpush.bf16.msrb.mxu2 %v1239_v2 }
  0x47   :  { %735 = vmatpush.bf16.msrb.mxu3 %v1247_v3 }
  0x48   :  { %694 = vmatpush.bf16.msrb.mxu0 %v1222_v4  ;;  %v1272_v4 = vld [vmem:[%s1445_s4] ss:$0 sm:$0xff]  ;;  %s845_s4 = sshll.u32 %s1390_s12, 4  ;;  %s846_s4 = int_to_ptr.vmem [resolvable:$true] %s845_s4 }
  0x49   :  { %708 = vmatpush.bf16.msrb.mxu1 %v1230_v5 }
  0x4a   :  { %722 = vmatpush.bf16.msrb.mxu2 %v1238_v6 }
  0x4b   :  { %736 = vmatpush.bf16.msrb.mxu3 %v1246_v7 }
  0x4c   :  { %695 = vmatpush.bf16.msrb.mxu0 %v1221_v8 }
  0x4d   :  { %709 = vmatpush.bf16.msrb.mxu1 %v1229_v9 }
  0x4e   :  { %723 = vmatpush.bf16.msrb.mxu2 %v1237_v10 }
  0x4f   :  { %737 = vmatpush.bf16.msrb.mxu3 %v1245_v11  ;;  %696 = vmatmul.bf16.vlgmr.msrb.gmra.mxu0 %v880_v20 }
  0x50   :  { %710 = vmatmul.bf16.vlgmr.msrb.gmra.mxu1 %v884_v21  ;;  %815 = vmatpush.bf16.msra.mxu0 %v1260_v24 }
  0x51   :  { %724 = vmatmul.bf16.vlgmr.msrb.gmra.mxu2 %v888_v22 }
  0x52   :  { %738 = vmatmul.bf16.vlgmr.msrb.gmra.mxu3 %v892_v23 }
  0x54   :  { %816 = vmatpush.bf16.msra.mxu0 %v1259_v25 }
  0x58   :  { %817 = vmatpush.bf16.msra.mxu0 %v1258_v26 }
  0x5c   :  { %818 = vmatpush.bf16.msra.mxu0 %v1257_v27 }
  0x60   :  { %819 = vmatpush.bf16.msra.mxu0 %v1256_v28 }
  0x64   :  { %820 = vmatpush.bf16.msra.mxu0 %v1255_v29 }
  0x68   :  { %821 = vmatpush.bf16.msra.mxu0 %v1254_v31 }
  0x6c   :  { %822 = vmatpush.bf16.msra.mxu0 %v1253_v33 }
  0xac   :  { %v641_v30 = vpop.f32.mrf.mxu0 }
  0xad   :  { %v655_v32 = vpop.f32.mrf.mxu1  ;;  %v642_v37 = vadd.f32 %v1271_v34, %v641_v30 }
  0xaf   :  { %v656_v40 = vadd.f32 %v655_v32, %v642_v37 }
  0xb4   :  { %v669_v35 = vpop.f32.mrf.mxu2  ;;  %v643_v38 = vpop.f32.mrf.mxu0 }
  0xb5   :  { %v683_v36 = vpop.f32.mrf.mxu3  ;;  %v657_v39 = vpop.f32.mrf.mxu1  ;;  %v644_v41 = vadd.f32 %v1271_v34, %v643_v38  ;;  %v670_v44 = vadd.f32 %v669_v35, %v656_v40 }
  0xb7   :  { %v658_v45 = vadd.f32 %v657_v39, %v644_v41  ;;  %v684_v48 = vadd.f32 %v683_v36, %v670_v44 }
  0xbc   :  { %v671_v42 = vpop.f32.mrf.mxu2 }
  0xbd   :  { %v685_v43 = vpop.f32.mrf.mxu3  ;;  %v672_v49 = vadd.f32 %v671_v42, %v658_v45 }
  0xbf   :  { %v686_v53 = vadd.f32 %v685_v43, %v672_v49 }
  0xcc   :  { %v697_v46 = vpop.f32.mrf.mxu0 }
  0xcd   :  { %v711_v47 = vpop.f32.mrf.mxu1  ;;  %v698_v50 = vadd.f32 %v697_v46, %v684_v48 }
  0xcf   :  { %v712_v55 = vadd.f32 %v711_v47, %v698_v50 }
  0xd4   :  { %v725_v51 = vpop.f32.mrf.mxu2  ;;  %v699_v54 = vpop.f32.mrf.mxu0 }
  0xd5   :  { %v739_v52 = vpop.f32.mrf.mxu3  ;;  %v700_v56 = vadd.f32 %v699_v54, %v686_v53  ;;  %v726_v57 = vadd.f32 %v725_v51, %v712_v55  ;;  %v713_v58 = vpop.f32.mrf.mxu1 }
  0xd7   :  { %v714_v59 = vadd.f32 %v713_v58, %v700_v56  ;;  %v740_v61 = vadd.f32 %v739_v52, %v726_v57 }
  0xd9   :  { %v744_v1 = vmax.f32 %v740_v61, 0.0 }
  0xdc   :  { %v727_v60 = vpop.f32.mrf.mxu2 }
  0xdd   :  { %v728_v62 = vadd.f32 %v727_v60, %v714_v59  ;;  %v741_v63 = vpop.f32.mrf.mxu3 }
  0xdf   :  { %v742_v0 = vadd.f32 %v741_v63, %v728_v62 }
  0xe1   :  { %v745_v2 = vmax.f32 %v742_v0, 0.0 }
  0xe3   :  { %v746_v3 = vpack.c.bf16 %v745_v2, %v744_v1 }
  0xe5   :  { %823 = vmatmul.bf16.vlgmr.msra.gmra.mxu0 %v746_v3 }
 0x162   :  { %v824_v5 = vpop.f32.mrf.mxu0 }
 0x163   :  { %v825_v6 = vadd.f32 %v1272_v4, %v824_v5 }
 0x165   :  { %v829_v7 = vsub.f32 0.0, %v825_v6 }
 0x167   :  { %v831_v8 = vmul.f32 1.442695, %v829_v7 }
 0x169   :  { %1273 = vpow2.f32 %v831_v8 }
 0x16a   :  { %v826_v9 = vpop.f32.mrf.mxu0 }
 0x16b   :  { %v827_v10 = vadd.f32 %v1272_v4, %v826_v9 }
 0x16d   :  { %v830_v11 = vsub.f32 0.0, %v827_v10 }
 0x16f   :  { %v1274_v12 = vpop.eup %1273  ;;  %v833_v13 = vmul.f32 1.442695, %v830_v11 }
 0x170   :  { %v835_v14 = vadd.f32 1.0, %v1274_v12 }
 0x171   :  { %1275 = vpow2.f32 %v833_v13 }
 0x172   :  { %1277 = vrcp.f32 %v835_v14 }
 0x177   :  { %v1276_v15 = vpop.eup %1275 }
 0x178   :  { %v1278_v16 = vpop.eup %1277  ;;  %v836_v17 = vadd.f32 1.0, %v1276_v15 }
 0x179   :  { %839 = vst [vmem:[#allocation8] sm:$0xff] %v1278_v16 }
 0x17a   :  { %1279 = vrcp.f32 %v836_v17 }
 0x180   :  { %v1280_v18 = vpop.eup %1279 }
 0x181   :  { %840 = vst [vmem:[#allocation8 + $0x8] sm:$0xff] %v1280_v18 }
 0x182   :  { %853 = dma.vmem_to_hbm [thread:$0]  %s846_s4, 256, %s848_s15, [#allocation4], %s1391_s16, %s1391_s16, %s1392_s17  }
 0x183   :  { %1381 = dma.done.wait [#allocation4], 256  }
 0x184   :  { %1382 = vsyncadd [#allocation4], 4294967040 }
 0x185   :  { %858 = vsyncpa [#allocation3], 1 }
 0x186   :  { %859 = vsyncpa [#allocation6], 1 }
 0x187   :  { %860 = vsyncpa [#allocation4], 1 }

</bundles_post_ra>
